<compile_context>
chip_gen: v6e
topology: v6e:2x2x1
jax: 0.10.0
libtpu: 0.0.40
codegen_flags: <defaults>
</compile_context>

<pallas_src>
import numpy as np
import jax
import jax.numpy as jnp
from jax.experimental import pallas as pl
from jax.experimental.pallas import tpu as pltpu


def _round_up(n, m):
    return ((n + m - 1) // m) * m


# ----------------------------- Pallas kernel ------------------------------- #
def _make_resnet_kernel(HP, TP):
    """HP/TP: hidden / target lane widths (padded to multiples of 128)."""

    def kernel(x_ref, w1_ref, w2a_ref, w2b_ref, w20_ref,
               w3a_ref, w3b_ref, w30_ref, w5a_ref, w5b_ref,
               b_ref, out_ref):
        bf16 = jnp.bfloat16

        def lrelu(v):  # F.leaky_relu default negative_slope = 0.01 (f32 epilogue)
            return jnp.where(v > 0, v, 0.01 * v)

        def mm(a, w_ref):
            # bf16 x bf16 MXU matmul, f32 accumulation
            return jnp.dot(a, w_ref[...], preferred_element_type=jnp.float32)

        # x streamed as raw f32 (tb, F); cast to bf16 once, in-kernel.
        xb = x_ref[...].astype(bf16)

        # x1 = leaky_relu(dense1(bn1(x)))                     [BN folded]
        x1 = lrelu(mm(xb, w1_ref) + b_ref[0:1, :HP])          # (tb, HP) f32
        x1b = x1.astype(bf16)

        # x2 = leaky_relu(dense2(bn2(cat[x, x1])))  -> two dots, no concat/scratch
        x2 = lrelu(mm(xb, w2a_ref) + mm(x1b, w2b_ref) + b_ref[1:2, :HP])
        # x2 = leaky_relu(dense20(bn20(x2)))
        x2 = lrelu(mm(x2.astype(bf16), w20_ref) + b_ref[2:3, :HP])
        x2b = x2.astype(bf16)

        # x3 = leaky_relu(dense3(bn3(cat[x1, x2])))
        x3 = lrelu(mm(x1b, w3a_ref) + mm(x2b, w3b_ref) + b_ref[3:4, :HP])
        # x3 = leaky_relu(dense30(bn30(x3)))
        x3 = lrelu(mm(x3.astype(bf16), w30_ref) + b_ref[4:5, :HP])
        x3b = x3.astype(bf16)

        # out = dense5(bn4(cat[x2, x3]))   (lane-dense 128-wide bf16 store)
        out = mm(x2b, w5a_ref) + mm(x3b, w5b_ref) + b_ref[5:6, :TP]
        out_ref[...] = out.astype(out_ref.dtype)

    return kernel


def resnet_forward(x, folded, num_targets, *, tile_b=2048):
    """x: (B, F) f32.  folded: dict from fold_and_pad_params."""
    F_, HP, TP = folded["dims"]
    B, F = x.shape
    assert F == F_

    tb = min(tile_b, _round_up(B, 16))
    if tb >= B and B >= 32:
        # keep >= 2 grid steps so both v7x TensorCores get work
        tb = _round_up((B + 1) // 2, 16)
    Bp = _round_up(B, tb)
    x_in = x if Bp == B else jnp.zeros((Bp, F), x.dtype).at[:B].set(x)

    kernel = _make_resnet_kernel(HP, TP)
    full = lambda i: (0, 0)                # weights / biases resident across grid
    bias_shape = folded["bias"].shape

    out = pl.pallas_call(
        kernel,
        out_shape=jax.ShapeDtypeStruct((Bp, TP), jnp.bfloat16),
        grid_spec=pltpu.PrefetchScalarGridSpec(
            num_scalar_prefetch=0,
            grid=(Bp // tb,),
            in_specs=[
                pl.BlockSpec((tb, F), lambda i: (i, 0)),   # x tile (pipelined, raw f32)
                pl.BlockSpec((F, HP), full),               # w1
                pl.BlockSpec((F, HP), full),               # w2[:F]   (x rows)
                pl.BlockSpec((HP, HP), full),              # w2[F:]   (x1 rows)
                pl.BlockSpec((HP, HP), full),              # w20
                pl.BlockSpec((HP, HP), full),              # w3[:H]   (x1 rows)
                pl.BlockSpec((HP, HP), full),              # w3[H:]   (x2 rows)
                pl.BlockSpec((HP, HP), full),              # w30
                pl.BlockSpec((HP, TP), full),              # w5[:H]   (x2 rows)
                pl.BlockSpec((HP, TP), full),              # w5[H:]   (x3 rows)
                pl.BlockSpec(bias_shape, full),            # packed biases (8, 128)
            ],
            out_specs=pl.BlockSpec((tb, TP), lambda i: (i, 0)),
        ),
        compiler_params=pltpu.CompilerParams(
            dimension_semantics=("parallel",),             # megacore batch split
            vmem_limit_bytes=32 * 1024 * 1024),            # headroom on v5e's 16 MiB default
    )(x_in, folded["w1"], folded["w2a"], folded["w2b"], folded["w20"],
      folded["w3a"], folded["w3b"], folded["w30"], folded["w5a"],
      folded["w5b"], folded["bias"])

    return out[:B, :num_targets].astype(jnp.float32)


# ------------------------- deterministic parameters ------------------------ #
def bn_affine(key, c):
    """Fold eval-mode BatchNorm1d into per-feature (scale, shift)."""
    k1, k2, k3, k4 = jax.random.split(key, 4)
    gamma = 1.0 + 0.1 * jax.random.normal(k1, (c,))
    beta = 0.1 * jax.random.normal(k2, (c,))
    rmean = 0.1 * jax.random.normal(k3, (c,))
    rvar = jnp.abs(jax.random.normal(k4, (c,))) + 0.5
    scale = gamma / jnp.sqrt(rvar + 1e-5)
    shift = beta - rmean * scale
    return scale.astype(jnp.float32), shift.astype(jnp.float32)


def wn_linear(key, fan_in, fan_out):
    """nn.utils.weight_norm(nn.Linear): effective weight == v at init (g = ||v||)."""
    k1, k2 = jax.random.split(key)
    bound = 1.0 / np.sqrt(fan_in)
    v = jax.random.uniform(k1, (fan_out, fan_in), minval=-bound, maxval=bound)
    g = jnp.linalg.norm(v, axis=1, keepdims=True)
    w = g * v / jnp.linalg.norm(v, axis=1, keepdims=True)      # == v
    b = jax.random.uniform(k2, (fan_out,), minval=-bound, maxval=bound)
    return w.T.astype(jnp.float32), b.astype(jnp.float32)      # [in, out], [out]


def build_params(key, F, H, T):
    keys = jax.random.split(key, 12)
    s1, t1 = bn_affine(keys[0], F)
    w1, b1 = wn_linear(keys[1], F, H)
    s2, t2 = bn_affine(keys[2], F + H)
    w2, b2 = wn_linear(keys[3], F + H, H)
    s20, t20 = bn_affine(keys[4], H)
    w20, b20 = wn_linear(keys[5], H, H)
    s3, t3 = bn_affine(keys[6], 2 * H)
    w3, b3 = wn_linear(keys[7], 2 * H, H)
    s30, t30 = bn_affine(keys[8], H)
    w30, b30 = wn_linear(keys[9], H, H)
    s4, t4 = bn_affine(keys[10], 2 * H)
    w5, b5 = wn_linear(keys[11], 2 * H, T)        # ispretrain=False -> dense5
    return dict(s1=s1, t1=t1, w1=w1, b1=b1, s2=s2, t2=t2, w2=w2, b2=b2,
                s20=s20, t20=t20, w20=w20, b20=b20, s3=s3, t3=t3, w3=w3, b3=b3,
                s30=s30, t30=t30, w30=w30, b30=b30, s4=s4, t4=t4, w5=w5, b5=b5)


def fold_and_pad_params(raw, F, H, T):
    """Fold eval-mode BN into weights/biases, split concat-facing weights into
    their row halves, pad hidden/target lane dims to 128, cast to bf16.

    INVARIANT: all padded weight rows/cols and padded bias lanes are exactly
    zero -- the kernel relies on this so padded activation lanes stay 0 and the
    raw (unpadded-in-F) x stream is safe.
    """
    HP, TP = _round_up(H, 128), _round_up(T, 128)

    def fold(s, t, w, b):
        # (x * s + t) @ W + b  ==  x @ (s[:,None] * W) + (t @ W + b)
        return s[:, None] * w, t @ w + b

    w1, b1 = fold(raw["s1"], raw["t1"], raw["w1"], raw["b1"])
    w2, b2 = fold(raw["s2"], raw["t2"], raw["w2"], raw["b2"])       # acts on cat[x, x1]
    w20, b20 = fold(raw["s20"], raw["t20"], raw["w20"], raw["b20"])
    w3, b3 = fold(raw["s3"], raw["t3"], raw["w3"], raw["b3"])       # acts on cat[x1, x2]
    w30, b30 = fold(raw["s30"], raw["t30"], raw["w30"], raw["b30"])
    w5, b5 = fold(raw["s4"], raw["t4"], raw["w5"], raw["b5"])       # acts on cat[x2, x3]

    def pad_w(w, rp, cp):
        p = jnp.zeros((rp, cp), jnp.float32).at[: w.shape[0], : w.shape[1]].set(w)
        return p.astype(jnp.bfloat16)

    params = dict(
        w1=pad_w(w1, F, HP),
        w2a=pad_w(w2[:F], F, HP), w2b=pad_w(w2[F:], HP, HP),
        w20=pad_w(w20, HP, HP),
        w3a=pad_w(w3[:H], HP, HP), w3b=pad_w(w3[H:], HP, HP),
        w30=pad_w(w30, HP, HP),
        w5a=pad_w(w5[:H], HP, TP), w5b=pad_w(w5[H:], HP, TP),
    )

    BW = max(HP, TP)
    bias = jnp.zeros((8, BW), jnp.float32)
    for i, b in enumerate([b1, b2, b20, b3, b30, b5]):
        bias = bias.at[i, : b.shape[0]].set(b)
    params["bias"] = bias
    params["dims"] = (F, HP, TP)
    return params


# ------------------------------ JAX reference ------------------------------ #
def reference_forward(x, p):
    """Literal f32 translation of resnetModel.forward (eval mode)."""
    lrelu = lambda v: jnp.where(v > 0, v, 0.01 * v)
    bn = lambda v, s, t: v * s + t
    x1 = lrelu(bn(x, p["s1"], p["t1"]) @ p["w1"] + p["b1"])
    xc = jnp.concatenate([x, x1], axis=1)
    x2 = lrelu(bn(xc, p["s2"], p["t2"]) @ p["w2"] + p["b2"])
    x2 = lrelu(bn(x2, p["s20"], p["t20"]) @ p["w20"] + p["b20"])
    xc = jnp.concatenate([x1, x2], axis=1)
    x3 = lrelu(bn(xc, p["s3"], p["t3"]) @ p["w3"] + p["b3"])
    x3 = lrelu(bn(x3, p["s30"], p["t30"]) @ p["w30"] + p["b30"])
    xc = jnp.concatenate([x2, x3], axis=1)
    return bn(xc, p["s4"], p["t4"]) @ p["w5"] + p["b5"]


# ----------------------------------- main ----------------------------------- #
if __name__ == "__main__":
    B, F, H, T = 16, 32, 32, 16   # batch, num_features, hidden_size, num_targets

    key = jax.random.PRNGKey(0)
    kx, kp = jax.random.split(key)
    x = jax.random.normal(kx, (B, F), dtype=jnp.float32)

    raw = build_params(kp, F, H, T)
    folded = fold_and_pad_params(raw, F, H, T)

    out = resnet_forward(x, folded, num_targets=T)
    out = jax.block_until_ready(out)

    ref = reference_forward(x, raw)
    # bf16 MXU inputs + bf16 output through 6 chained matmuls vs a pure-f32
    # reference: tolerance widened accordingly (semantics, not bit-exactness).
    np.testing.assert_allclose(np.asarray(out), np.asarray(ref), rtol=5e-2, atol=1e-1)

    print("KERNEL_OK")
</pallas_src>

<mosaic_0001>
module attributes {stable_mosaic.version = 11 : i64} {
  func.func @kernel(%arg0: i32, %arg1: memref<16x32xf32, #tpu.memory_space<vmem>>, %arg2: memref<32x128xbf16, #tpu.memory_space<vmem>>, %arg3: memref<32x128xbf16, #tpu.memory_space<vmem>>, %arg4: memref<128x128xbf16, #tpu.memory_space<vmem>>, %arg5: memref<128x128xbf16, #tpu.memory_space<vmem>>, %arg6: memref<128x128xbf16, #tpu.memory_space<vmem>>, %arg7: memref<128x128xbf16, #tpu.memory_space<vmem>>, %arg8: memref<128x128xbf16, #tpu.memory_space<vmem>>, %arg9: memref<128x128xbf16, #tpu.memory_space<vmem>>, %arg10: memref<128x128xbf16, #tpu.memory_space<vmem>>, %arg11: memref<8x128xf32, #tpu.memory_space<vmem>>, %arg12: memref<16x128xbf16, #tpu.memory_space<vmem>>) attributes {dimension_semantics = [#tpu.dimension_semantics<parallel>], iteration_bounds = array<i64: 1>, scalar_prefetch = 0 : i64, scratch_operands = 0 : i64, tpu.core_type = #tpu.core_type<tc>, window_params = [{transform_indices = @transform_0, window_bounds = array<i64: 16, 32>}, {pipeline_mode = #tpu.pipeline_mode<synchronous>, transform_indices = @transform_1, window_bounds = array<i64: 32, 128>}, {pipeline_mode = #tpu.pipeline_mode<synchronous>, transform_indices = @transform_2, window_bounds = array<i64: 32, 128>}, {pipeline_mode = #tpu.pipeline_mode<synchronous>, transform_indices = @transform_3, window_bounds = array<i64: 128, 128>}, {pipeline_mode = #tpu.pipeline_mode<synchronous>, transform_indices = @transform_4, window_bounds = array<i64: 128, 128>}, {pipeline_mode = #tpu.pipeline_mode<synchronous>, transform_indices = @transform_5, window_bounds = array<i64: 128, 128>}, {pipeline_mode = #tpu.pipeline_mode<synchronous>, transform_indices = @transform_6, window_bounds = array<i64: 128, 128>}, {pipeline_mode = #tpu.pipeline_mode<synchronous>, transform_indices = @transform_7, window_bounds = array<i64: 128, 128>}, {pipeline_mode = #tpu.pipeline_mode<synchronous>, transform_indices = @transform_8, window_bounds = array<i64: 128, 128>}, {pipeline_mode = #tpu.pipeline_mode<synchronous>, transform_indices = @transform_9, window_bounds = array<i64: 128, 128>}, {pipeline_mode = #tpu.pipeline_mode<synchronous>, transform_indices = @transform_10, window_bounds = array<i64: 8, 128>}, {transform_indices = @transform_11, window_bounds = array<i64: 16, 128>}]} {
    %c0 = arith.constant 0 : index
    %c0_0 = arith.constant 0 : index
    %0 = vector.load %arg1[%c0, %c0_0] : memref<16x32xf32, #tpu.memory_space<vmem>>, vector<16x32xf32>
    %1 = arith.truncf %0 : vector<16x32xf32> to vector<16x32xbf16>
    %c0_1 = arith.constant 0 : index
    %c0_2 = arith.constant 0 : index
    %2 = vector.load %arg2[%c0_1, %c0_2] : memref<32x128xbf16, #tpu.memory_space<vmem>>, vector<32x128xbf16>
    %cst = arith.constant dense<0.000000e+00> : vector<16x128xf32>
    %3 = tpu.matmul %1, %2, %cst {dimension_numbers = #tpu.dot_dimension_numbers<[1], [0], [0], [1], [0, 0, 1, 1], [], []>} : vector<16x32xbf16>, vector<32x128xbf16>, vector<16x128xf32> -> vector<16x128xf32>
    %c0_3 = arith.constant 0 : index
    %c0_4 = arith.constant 0 : index
    %4 = vector.load %arg11[%c0_3, %c0_4] : memref<8x128xf32, #tpu.memory_space<vmem>>, vector<1x128xf32>
    %5 = vector.broadcast %4 : vector<1x128xf32> to vector<16x128xf32>
    %6 = arith.addf %3, %5 : vector<16x128xf32>
    %cst_5 = arith.constant 0.000000e+00 : f32
    %7 = vector.broadcast %cst_5 : f32 to vector<16x128xf32>
    %8 = arith.cmpf ogt, %6, %7 : vector<16x128xf32>
    %cst_6 = arith.constant 0.00999999977 : f32
    %9 = vector.broadcast %cst_6 : f32 to vector<16x128xf32>
    %10 = arith.mulf %9, %6 : vector<16x128xf32>
    %11 = arith.select %8, %6, %10 : vector<16x128xi1>, vector<16x128xf32>
    %12 = arith.truncf %11 : vector<16x128xf32> to vector<16x128xbf16>
    %c0_7 = arith.constant 0 : index
    %c0_8 = arith.constant 0 : index
    %13 = vector.load %arg3[%c0_7, %c0_8] : memref<32x128xbf16, #tpu.memory_space<vmem>>, vector<32x128xbf16>
    %cst_9 = arith.constant dense<0.000000e+00> : vector<16x128xf32>
    %14 = tpu.matmul %1, %13, %cst_9 {dimension_numbers = #tpu.dot_dimension_numbers<[1], [0], [0], [1], [0, 0, 1, 1], [], []>} : vector<16x32xbf16>, vector<32x128xbf16>, vector<16x128xf32> -> vector<16x128xf32>
    %c0_10 = arith.constant 0 : index
    %c0_11 = arith.constant 0 : index
    %15 = vector.load %arg4[%c0_10, %c0_11] : memref<128x128xbf16, #tpu.memory_space<vmem>>, vector<128x128xbf16>
    %cst_12 = arith.constant dense<0.000000e+00> : vector<16x128xf32>
    %16 = tpu.matmul %12, %15, %cst_12 {dimension_numbers = #tpu.dot_dimension_numbers<[1], [0], [0], [1], [0, 0, 1, 1], [], []>} : vector<16x128xbf16>, vector<128x128xbf16>, vector<16x128xf32> -> vector<16x128xf32>
    %17 = arith.addf %14, %16 : vector<16x128xf32>
    %c1 = arith.constant 1 : index
    %c0_13 = arith.constant 0 : index
    %18 = vector.load %arg11[%c1, %c0_13] : memref<8x128xf32, #tpu.memory_space<vmem>>, vector<1x128xf32>
    %19 = vector.broadcast %18 : vector<1x128xf32> to vector<16x128xf32>
    %20 = arith.addf %17, %19 : vector<16x128xf32>
    %cst_14 = arith.constant 0.000000e+00 : f32
    %21 = vector.broadcast %cst_14 : f32 to vector<16x128xf32>
    %22 = arith.cmpf ogt, %20, %21 : vector<16x128xf32>
    %cst_15 = arith.constant 0.00999999977 : f32
    %23 = vector.broadcast %cst_15 : f32 to vector<16x128xf32>
    %24 = arith.mulf %23, %20 : vector<16x128xf32>
    %25 = arith.select %22, %20, %24 : vector<16x128xi1>, vector<16x128xf32>
    %26 = arith.truncf %25 : vector<16x128xf32> to vector<16x128xbf16>
    %c0_16 = arith.constant 0 : index
    %c0_17 = arith.constant 0 : index
    %27 = vector.load %arg5[%c0_16, %c0_17] : memref<128x128xbf16, #tpu.memory_space<vmem>>, vector<128x128xbf16>
    %cst_18 = arith.constant dense<0.000000e+00> : vector<16x128xf32>
    %28 = tpu.matmul %26, %27, %cst_18 {dimension_numbers = #tpu.dot_dimension_numbers<[1], [0], [0], [1], [0, 0, 1, 1], [], []>} : vector<16x128xbf16>, vector<128x128xbf16>, vector<16x128xf32> -> vector<16x128xf32>
    %c2 = arith.constant 2 : index
    %c0_19 = arith.constant 0 : index
    %29 = vector.load %arg11[%c2, %c0_19] : memref<8x128xf32, #tpu.memory_space<vmem>>, vector<1x128xf32>
    %30 = vector.broadcast %29 : vector<1x128xf32> to vector<16x128xf32>
    %31 = arith.addf %28, %30 : vector<16x128xf32>
    %cst_20 = arith.constant 0.000000e+00 : f32
    %32 = vector.broadcast %cst_20 : f32 to vector<16x128xf32>
    %33 = arith.cmpf ogt, %31, %32 : vector<16x128xf32>
    %cst_21 = arith.constant 0.00999999977 : f32
    %34 = vector.broadcast %cst_21 : f32 to vector<16x128xf32>
    %35 = arith.mulf %34, %31 : vector<16x128xf32>
    %36 = arith.select %33, %31, %35 : vector<16x128xi1>, vector<16x128xf32>
    %37 = arith.truncf %36 : vector<16x128xf32> to vector<16x128xbf16>
    %c0_22 = arith.constant 0 : index
    %c0_23 = arith.constant 0 : index
    %38 = vector.load %arg6[%c0_22, %c0_23] : memref<128x128xbf16, #tpu.memory_space<vmem>>, vector<128x128xbf16>
    %cst_24 = arith.constant dense<0.000000e+00> : vector<16x128xf32>
    %39 = tpu.matmul %12, %38, %cst_24 {dimension_numbers = #tpu.dot_dimension_numbers<[1], [0], [0], [1], [0, 0, 1, 1], [], []>} : vector<16x128xbf16>, vector<128x128xbf16>, vector<16x128xf32> -> vector<16x128xf32>
    %c0_25 = arith.constant 0 : index
    %c0_26 = arith.constant 0 : index
    %40 = vector.load %arg7[%c0_25, %c0_26] : memref<128x128xbf16, #tpu.memory_space<vmem>>, vector<128x128xbf16>
    %cst_27 = arith.constant dense<0.000000e+00> : vector<16x128xf32>
    %41 = tpu.matmul %37, %40, %cst_27 {dimension_numbers = #tpu.dot_dimension_numbers<[1], [0], [0], [1], [0, 0, 1, 1], [], []>} : vector<16x128xbf16>, vector<128x128xbf16>, vector<16x128xf32> -> vector<16x128xf32>
    %42 = arith.addf %39, %41 : vector<16x128xf32>
    %c3 = arith.constant 3 : index
    %c0_28 = arith.constant 0 : index
    %43 = vector.load %arg11[%c3, %c0_28] : memref<8x128xf32, #tpu.memory_space<vmem>>, vector<1x128xf32>
    %44 = vector.broadcast %43 : vector<1x128xf32> to vector<16x128xf32>
    %45 = arith.addf %42, %44 : vector<16x128xf32>
    %cst_29 = arith.constant 0.000000e+00 : f32
    %46 = vector.broadcast %cst_29 : f32 to vector<16x128xf32>
    %47 = arith.cmpf ogt, %45, %46 : vector<16x128xf32>
    %cst_30 = arith.constant 0.00999999977 : f32
    %48 = vector.broadcast %cst_30 : f32 to vector<16x128xf32>
    %49 = arith.mulf %48, %45 : vector<16x128xf32>
    %50 = arith.select %47, %45, %49 : vector<16x128xi1>, vector<16x128xf32>
    %51 = arith.truncf %50 : vector<16x128xf32> to vector<16x128xbf16>
    %c0_31 = arith.constant 0 : index
    %c0_32 = arith.constant 0 : index
    %52 = vector.load %arg8[%c0_31, %c0_32] : memref<128x128xbf16, #tpu.memory_space<vmem>>, vector<128x128xbf16>
    %cst_33 = arith.constant dense<0.000000e+00> : vector<16x128xf32>
    %53 = tpu.matmul %51, %52, %cst_33 {dimension_numbers = #tpu.dot_dimension_numbers<[1], [0], [0], [1], [0, 0, 1, 1], [], []>} : vector<16x128xbf16>, vector<128x128xbf16>, vector<16x128xf32> -> vector<16x128xf32>
    %c4 = arith.constant 4 : index
    %c0_34 = arith.constant 0 : index
    %54 = vector.load %arg11[%c4, %c0_34] : memref<8x128xf32, #tpu.memory_space<vmem>>, vector<1x128xf32>
    %55 = vector.broadcast %54 : vector<1x128xf32> to vector<16x128xf32>
    %56 = arith.addf %53, %55 : vector<16x128xf32>
    %cst_35 = arith.constant 0.000000e+00 : f32
    %57 = vector.broadcast %cst_35 : f32 to vector<16x128xf32>
    %58 = arith.cmpf ogt, %56, %57 : vector<16x128xf32>
    %cst_36 = arith.constant 0.00999999977 : f32
    %59 = vector.broadcast %cst_36 : f32 to vector<16x128xf32>
    %60 = arith.mulf %59, %56 : vector<16x128xf32>
    %61 = arith.select %58, %56, %60 : vector<16x128xi1>, vector<16x128xf32>
    %62 = arith.truncf %61 : vector<16x128xf32> to vector<16x128xbf16>
    %c0_37 = arith.constant 0 : index
    %c0_38 = arith.constant 0 : index
    %63 = vector.load %arg9[%c0_37, %c0_38] : memref<128x128xbf16, #tpu.memory_space<vmem>>, vector<128x128xbf16>
    %cst_39 = arith.constant dense<0.000000e+00> : vector<16x128xf32>
    %64 = tpu.matmul %37, %63, %cst_39 {dimension_numbers = #tpu.dot_dimension_numbers<[1], [0], [0], [1], [0, 0, 1, 1], [], []>} : vector<16x128xbf16>, vector<128x128xbf16>, vector<16x128xf32> -> vector<16x128xf32>
    %c0_40 = arith.constant 0 : index
    %c0_41 = arith.constant 0 : index
    %65 = vector.load %arg10[%c0_40, %c0_41] : memref<128x128xbf16, #tpu.memory_space<vmem>>, vector<128x128xbf16>
    %cst_42 = arith.constant dense<0.000000e+00> : vector<16x128xf32>
    %66 = tpu.matmul %62, %65, %cst_42 {dimension_numbers = #tpu.dot_dimension_numbers<[1], [0], [0], [1], [0, 0, 1, 1], [], []>} : vector<16x128xbf16>, vector<128x128xbf16>, vector<16x128xf32> -> vector<16x128xf32>
    %67 = arith.addf %64, %66 : vector<16x128xf32>
    %c5 = arith.constant 5 : index
    %c0_43 = arith.constant 0 : index
    %68 = vector.load %arg11[%c5, %c0_43] : memref<8x128xf32, #tpu.memory_space<vmem>>, vector<1x128xf32>
    %69 = vector.broadcast %68 : vector<1x128xf32> to vector<16x128xf32>
    %70 = arith.addf %67, %69 : vector<16x128xf32>
    %71 = arith.truncf %70 : vector<16x128xf32> to vector<16x128xbf16>
    %c0_44 = arith.constant 0 : index
    %c0_45 = arith.constant 0 : index
    %72 = vector.load %arg12[%c0_44, %c0_45] : memref<16x128xbf16, #tpu.memory_space<vmem>>, vector<16x128xbf16>
    tpu.vector_store %arg12[%c0_44, %c0_45], %71 {strides = array<i32>} : memref<16x128xbf16, #tpu.memory_space<vmem>>, vector<16x128xbf16>,
    return
  }
  func.func @transform_0(%arg0: i32) -> (i32, i32) {
    %c0_i32 = arith.constant 0 : i32
    %c0_i32_0 = arith.constant 0 : i32
    return %arg0, %c0_i32 : i32, i32
  }
  func.func @transform_1(%arg0: i32) -> (i32, i32) {
    %c0_i32 = arith.constant 0 : i32
    %c0_i32_0 = arith.constant 0 : i32
    %c0_i32_1 = arith.constant 0 : i32
    return %c0_i32, %c0_i32_0 : i32, i32
  }
  func.func @transform_2(%arg0: i32) -> (i32, i32) {
    %c0_i32 = arith.constant 0 : i32
    %c0_i32_0 = arith.constant 0 : i32
    %c0_i32_1 = arith.constant 0 : i32
    return %c0_i32, %c0_i32_0 : i32, i32
  }
  func.func @transform_3(%arg0: i32) -> (i32, i32) {
    %c0_i32 = arith.constant 0 : i32
    %c0_i32_0 = arith.constant 0 : i32
    %c0_i32_1 = arith.constant 0 : i32
    return %c0_i32, %c0_i32_0 : i32, i32
  }
  func.func @transform_4(%arg0: i32) -> (i32, i32) {
    %c0_i32 = arith.constant 0 : i32
    %c0_i32_0 = arith.constant 0 : i32
    %c0_i32_1 = arith.constant 0 : i32
    return %c0_i32, %c0_i32_0 : i32, i32
  }
  func.func @transform_5(%arg0: i32) -> (i32, i32) {
    %c0_i32 = arith.constant 0 : i32
    %c0_i32_0 = arith.constant 0 : i32
    %c0_i32_1 = arith.constant 0 : i32
    return %c0_i32, %c0_i32_0 : i32, i32
  }
  func.func @transform_6(%arg0: i32) -> (i32, i32) {
    %c0_i32 = arith.constant 0 : i32
    %c0_i32_0 = arith.constant 0 : i32
    %c0_i32_1 = arith.constant 0 : i32
    return %c0_i32, %c0_i32_0 : i32, i32
  }
  func.func @transform_7(%arg0: i32) -> (i32, i32) {
    %c0_i32 = arith.constant 0 : i32
    %c0_i32_0 = arith.constant 0 : i32
    %c0_i32_1 = arith.constant 0 : i32
    return %c0_i32, %c0_i32_0 : i32, i32
  }
  func.func @transform_8(%arg0: i32) -> (i32, i32) {
    %c0_i32 = arith.constant 0 : i32
    %c0_i32_0 = arith.constant 0 : i32
    %c0_i32_1 = arith.constant 0 : i32
    return %c0_i32, %c0_i32_0 : i32, i32
  }
  func.func @transform_9(%arg0: i32) -> (i32, i32) {
    %c0_i32 = arith.constant 0 : i32
    %c0_i32_0 = arith.constant 0 : i32
    %c0_i32_1 = arith.constant 0 : i32
    return %c0_i32, %c0_i32_0 : i32, i32
  }
  func.func @transform_10(%arg0: i32) -> (i32, i32) {
    %c0_i32 = arith.constant 0 : i32
    %c0_i32_0 = arith.constant 0 : i32
    %c0_i32_1 = arith.constant 0 : i32
    return %c0_i32, %c0_i32_0 : i32, i32
  }
  func.func @transform_11(%arg0: i32) -> (i32, i32) {
    %c0_i32 = arith.constant 0 : i32
    %c0_i32_0 = arith.constant 0 : i32
    return %arg0, %c0_i32 : i32, i32
  }
}

</mosaic_0001>

<bundles_post_ra>
// kernel: tpu_custom_call.1
= control target key start
LH: loop header
LB: loop body
LE: loop exit
PB: predicated region body
PF: predicated region fallthrough
CT: control target
= control target key end

     0   :  { %16 = vsyncpa [#allocation3], 0  ;;  %s1994_s0 = inlined_call_operand.hbm [shape: f32[16,32], index: 0, kind: input, shape index: {}]   ;;  %s1995_s1 = inlined_call_operand.hbm [shape: bf16[32,128], index: 1, kind: input, shape index: {}]   ;;  %s1996_s2 = inlined_call_operand.hbm [shape: bf16[32,128], index: 2, kind: input, shape index: {}]   ;;  %s1997_s3 = inlined_call_operand.hbm [shape: bf16[128,128], index: 3, kind: input, shape index: {}]   ;;  %s1998_s4 = inlined_call_operand.hbm [shape: bf16[128,128], index: 4, kind: input, shape index: {}]   ;;  %s1999_s5 = inlined_call_operand.hbm [shape: bf16[128,128], index: 5, kind: input, shape index: {}]   ;;  %s2000_s6 = inlined_call_operand.hbm [shape: bf16[128,128], index: 6, kind: input, shape index: {}]   ;;  %s2001_s7 = inlined_call_operand.hbm [shape: bf16[128,128], index: 7, kind: input, shape index: {}]   ;;  %s2002_s8 = inlined_call_operand.hbm [shape: bf16[128,128], index: 8, kind: input, shape index: {}]   ;;  %s2003_s9 = inlined_call_operand.hbm [shape: bf16[128,128], index: 9, kind: input, shape index: {}]   ;;  %s2004_s10 = inlined_call_operand.vmem [shape: f32[8,128], index: 10, kind: input, shape index: {}]   ;;  %s2005_s11 = inlined_call_operand.hbm [shape: bf16[16,128], index: 11, kind: output, shape index: {}]  }
   0x1   :  { %17 = vsyncpa [#allocation6], 0 }
   0x2   :  { %18 = vsyncpa [#allocation9], 0 }
   0x3   :  { %19 = vsyncpa [#allocation12], 0 }
   0x4   :  { %20 = vsyncpa [#allocation15], 0 }
   0x5   :  { %21 = vsyncpa [#allocation18], 0 }
   0x6   :  { %22 = vsyncpa [#allocation4], 0  ;;  %s1748_s17 = smov [#allocation5]  }
   0x7   :  { %s40_s18 = sshll.u32 %s1748_s17, 4  ;;  %s41_s18 = int_to_ptr.vmem [resolvable:$true] %s40_s18 }
   0x8   :  { %s1522_s19 = scalar_lea.vmem %s41_s18, 256  ;;  %p1527_p1 = scmp.lt.s32.totalorder %s41_s18, %s41_s18 }
   0x9   :  { %p1523_p0 = scmp.ne.s32.totalorder %s41_s18, %s1522_s19  ;;  %p1528_p2 = scmp.lt.s32.totalorder %s1522_s19, %s1522_s19 }
   0xb   :  { %p1529_p3 = por %p1528_p2, %p1527_p1 }
   0xd   :  { %p1530_p4 = pnand %p1529_p3, %p1523_p0 }
   0xf   :  { %1533 = shalt.err (!%p1530_p4)
}
  0x10   :  { %s1749_s20 = smov 64   ;;  %s1750_s21 = smov 4  }
  0x11   :  { %46 = dma.hbm_to_vmem [thread:$0]  %s1995_s1, 256, %s41_s18, [#allocation6], %s1749_s20, %s1749_s20, %s1750_s21  }
  0x12   :  { %s1751_s24 = smov [#allocation8]   ;;  %s1752_s26 = smov [#allocation11]  }
  0x13   :  { %s64_s25 = sshll.u32 %s1751_s24, 4  ;;  %s88_s27 = sshll.u32 %s1752_s26, 4  ;;  %s65_s25 = int_to_ptr.vmem [resolvable:$true] %s64_s25  ;;  %s89_s27 = int_to_ptr.vmem [resolvable:$true] %s88_s27 }
  0x14   :  { %s1542_s28 = scalar_lea.vmem %s65_s25, 1024  ;;  %p1547_p6 = scmp.lt.s32.totalorder %s65_s25, %s65_s25 }
  0x15   :  { %p1543_p5 = scmp.ne.s32.totalorder %s65_s25, %s1542_s28  ;;  %p1548_p7 = scmp.lt.s32.totalorder %s1542_s28, %s1542_s28 }
  0x17   :  { %p1549_p8 = por %p1548_p7, %p1547_p6 }
  0x19   :  { %p1550_p9 = pnand %p1549_p8, %p1543_p5 }
  0x1b   :  { %1553 = shalt.err (!%p1550_p9)
}
  0x1c   :  { %70 = dma.hbm_to_vmem [thread:$0]  %s1997_s3, 1024, %s65_s25, [#allocation9], %s1749_s20, %s1749_s20, %s1750_s21  }
  0x1d   :  { %s1562_s1 = scalar_lea.vmem %s89_s27, 1024  ;;  %p1567_p11 = scmp.lt.s32.totalorder %s89_s27, %s89_s27 }
  0x1e   :  { %p1563_p10 = scmp.ne.s32.totalorder %s89_s27, %s1562_s1  ;;  %p1568_p12 = scmp.lt.s32.totalorder %s1562_s1, %s1562_s1 }
  0x20   :  { %p1569_p13 = por %p1568_p12, %p1567_p11 }
  0x22   :  { %p1570_p0 = pnand %p1569_p13, %p1563_p10 }
  0x24   :  { %1573 = shalt.err (!%p1570_p0)
}
  0x25   :  { %94 = dma.hbm_to_vmem [thread:$0]  %s1999_s5, 1024, %s89_s27, [#allocation12], %s1749_s20, %s1749_s20, %s1750_s21  }
  0x26   :  { %s1753_s14 = smov [#allocation14]   ;;  %s1754_s16 = smov [#allocation2]  }
  0x27   :  { %s112_s15 = sshll.u32 %s1753_s14, 4  ;;  %s28_s3 = sshll.u32 %s1754_s16, 4  ;;  %s113_s15 = int_to_ptr.vmem [resolvable:$true] %s112_s15  ;;  %s29_s3 = int_to_ptr.vmem [resolvable:$true] %s28_s3 }
  0x28   :  { %s1582_s17 = scalar_lea.vmem %s113_s15, 1024  ;;  %p1587_p2 = scmp.lt.s32.totalorder %s113_s15, %s113_s15 }
  0x29   :  { %p1583_p1 = scmp.ne.s32.totalorder %s113_s15, %s1582_s17  ;;  %p1588_p3 = scmp.lt.s32.totalorder %s1582_s17, %s1582_s17 }
  0x2b   :  { %p1589_p4 = por %p1588_p3, %p1587_p2 }
  0x2d   :  { %p1590_p5 = pnand %p1589_p4, %p1583_p1 }
  0x2f   :  { %1593 = shalt.err (!%p1590_p5)
}
  0x30   :  { %118 = dma.hbm_to_vmem [thread:$0]  %s2001_s7, 1024, %s113_s15, [#allocation15], %s1749_s20, %s1749_s20, %s1750_s21  }
  0x31   :  { %s1602_s5 = scalar_lea.vmem %s29_s3, 256  ;;  %p1607_p7 = scmp.lt.s32.totalorder %s29_s3, %s29_s3 }
  0x32   :  { %p1603_p6 = scmp.ne.s32.totalorder %s29_s3, %s1602_s5  ;;  %p1608_p8 = scmp.lt.s32.totalorder %s1602_s5, %s1602_s5 }
  0x34   :  { %p1609_p9 = por %p1608_p8, %p1607_p7 }
  0x36   :  { %p1610_p10 = pnand %p1609_p9, %p1603_p6 }
  0x38   :  { %1613 = shalt.err (!%p1610_p10)
}
  0x39   :  { %s1755_s22 = smov 128   ;;  %s1756_s23 = smov 8  }
  0x3a   :  { %34 = dma.hbm_to_vmem [thread:$0]  %s1994_s0, 256, %s29_s3, [#allocation3], %s1755_s22, %s1755_s22, %s1756_s23  }
  0x3b   :  { %s1757_s26 = smov [#allocation7]   ;;  %s1758_s28 = smov [#allocation10]  }
  0x3c   :  { %s52_s27 = sshll.u32 %s1757_s26, 4  ;;  %s76_s29 = sshll.u32 %s1758_s28, 4  ;;  %s53_s27 = int_to_ptr.vmem [resolvable:$true] %s52_s27  ;;  %s77_s29 = int_to_ptr.vmem [resolvable:$true] %s76_s29 }
  0x3d   :  { %s1622_s7 = scalar_lea.vmem %s53_s27, 256  ;;  %p1627_p12 = scmp.lt.s32.totalorder %s53_s27, %s53_s27 }
  0x3e   :  { %p1623_p11 = scmp.ne.s32.totalorder %s53_s27, %s1622_s7  ;;  %p1628_p13 = scmp.lt.s32.totalorder %s1622_s7, %s1622_s7 }
  0x40   :  { %p1629_p0 = por %p1628_p13, %p1627_p12 }
  0x42   :  { %p1630_p1 = pnand %p1629_p0, %p1623_p11 }
  0x44   :  { %1633 = shalt.err (!%p1630_p1)
}
  0x45   :  { %58 = dma.hbm_to_vmem [thread:$0]  %s1996_s2, 256, %s53_s27, [#allocation6], %s1749_s20, %s1749_s20, %s1750_s21  }
  0x46   :  { %s1642_s0 = scalar_lea.vmem %s77_s29, 1024  ;;  %p1647_p3 = scmp.lt.s32.totalorder %s77_s29, %s77_s29 }
  0x47   :  { %p1643_p2 = scmp.ne.s32.totalorder %s77_s29, %s1642_s0  ;;  %p1648_p4 = scmp.lt.s32.totalorder %s1642_s0, %s1642_s0 }
  0x49   :  { %p1649_p5 = por %p1648_p4, %p1647_p3 }
  0x4b   :  { %p1650_p6 = pnand %p1649_p5, %p1643_p2 }
  0x4d   :  { %1653 = shalt.err (!%p1650_p6)
}
  0x4e   :  { %82 = dma.hbm_to_vmem [thread:$0]  %s1998_s4, 1024, %s77_s29, [#allocation9], %s1749_s20, %s1749_s20, %s1750_s21  }
  0x4f   :  { %s1759_s14 = smov [#allocation13]   ;;  %s1760_s16 = smov [#allocation16]  }
  0x50   :  { %s100_s15 = sshll.u32 %s1759_s14, 4  ;;  %s124_s2 = sshll.u32 %s1760_s16, 4  ;;  %s101_s15 = int_to_ptr.vmem [resolvable:$true] %s100_s15  ;;  %s125_s2 = int_to_ptr.vmem [resolvable:$true] %s124_s2 }
  0x51   :  { %s1662_s3 = scalar_lea.vmem %s101_s15, 1024  ;;  %p1667_p8 = scmp.lt.s32.totalorder %s101_s15, %s101_s15 }
  0x52   :  { %p1663_p7 = scmp.ne.s32.totalorder %s101_s15, %s1662_s3  ;;  %p1668_p9 = scmp.lt.s32.totalorder %s1662_s3, %s1662_s3 }
  0x54   :  { %p1669_p10 = por %p1668_p9, %p1667_p8 }
  0x56   :  { %p1670_p11 = pnand %p1669_p10, %p1663_p7 }
  0x58   :  { %1673 = shalt.err (!%p1670_p11)
}
  0x59   :  { %106 = dma.hbm_to_vmem [thread:$0]  %s2000_s6, 1024, %s101_s15, [#allocation12], %s1749_s20, %s1749_s20, %s1750_s21  }
  0x5a   :  { %s1682_s4 = scalar_lea.vmem %s125_s2, 1024  ;;  %p1687_p13 = scmp.lt.s32.totalorder %s125_s2, %s125_s2 }
  0x5b   :  { %p1683_p12 = scmp.ne.s32.totalorder %s125_s2, %s1682_s4  ;;  %p1688_p0 = scmp.lt.s32.totalorder %s1682_s4, %s1682_s4 }
  0x5d   :  { %p1689_p1 = por %p1688_p0, %p1687_p13 }
  0x5f   :  { %p1690_p2 = pnand %p1689_p1, %p1683_p12 }
  0x61   :  { %1693 = shalt.err (!%p1690_p2)
}
  0x62   :  { %130 = dma.hbm_to_vmem [thread:$0]  %s2002_s8, 1024, %s125_s2, [#allocation15], %s1749_s20, %s1749_s20, %s1750_s21  }
  0x63   :  { %s1761_s22 = smov [#allocation17]  }
  0x64   :  { %s136_s23 = sshll.u32 %s1761_s22, 4  ;;  %s137_s23 = int_to_ptr.vmem [resolvable:$true] %s136_s23 }
  0x65   :  { %s1702_s24 = scalar_lea.vmem %s137_s23, 1024  ;;  %p1707_p4 = scmp.lt.s32.totalorder %s137_s23, %s137_s23 }
  0x66   :  { %p1703_p3 = scmp.ne.s32.totalorder %s137_s23, %s1702_s24  ;;  %p1708_p5 = scmp.lt.s32.totalorder %s1702_s24, %s1702_s24 }
  0x68   :  { %p1709_p6 = por %p1708_p5, %p1707_p4 }
  0x6a   :  { %p1710_p7 = pnand %p1709_p6, %p1703_p3 }
  0x6c   :  { %1713 = shalt.err (!%p1710_p7)
}
  0x6d   :  { %142 = dma.hbm_to_vmem [thread:$0]  %s2003_s9, 1024, %s137_s23, [#allocation18], %s1749_s20, %s1749_s20, %s1750_s21  }
  0x6e   :  { %1734 = dma.done.wait [#allocation3], 256  }
  0x6f   :  { %1735 = vsyncadd [#allocation3], 4294967040 }
  0x70   :  { %1736 = dma.done.wait [#allocation6], 512  }
  0x71   :  { %1737 = vsyncadd [#allocation6], 4294966784 }
  0x72   :  { %1738 = dma.done.wait [#allocation9], 2048  }
  0x73   :  { %1739 = vsyncadd [#allocation9], 4294965248 }
  0x74   :  { %1740 = dma.done.wait [#allocation12], 2048  }
  0x75   :  { %1741 = vsyncadd [#allocation12], 4294965248 }
  0x76   :  { %1742 = dma.done.wait [#allocation15], 2048  }
  0x77   :  { %1743 = vsyncadd [#allocation15], 4294965248 }
  0x78   :  { %1744 = dma.done.wait [#allocation18], 1024  }
  0x79   :  { %1745 = vsyncadd [#allocation18], 4294966272  ;;  %v1762_v0 = vmov 0.0   ;;  %vm1763_vm0 = vmmov 0   ;;  %v1454_v1 = vld [vmem:[#allocation5 + $0x8] sm:$0xff]   ;;  %v1455_v2 = vld [vmem:[#allocation5] sm:$0xff]  }
  0x7a   :  { %1281 = vmatprep.subr.bf16.mxu0 %v1762_v0  ;;  %1285 = vmatprep.mubr.msk.bf16.mxu0 %vm1763_vm0, %v1762_v0  ;;  %v176_v3 = vld [vmem:[#allocation2] sm:$0xff]  ;;  %v177_v4 = vld [vmem:[#allocation2 + $0x8] sm:$0xff]  ;;  %vm200_vm1 = vcmask 261120   ;;  %v1458_v8 = vld [vmem:[#allocation8 + $0x28] sm:$0xff]   ;;  %s1764_s14 = smov [#allocation19]  }
  0x7b   :  { %1289 = vmatprep.subr.bf16.mxu1 %v1762_v0  ;;  %1305 = vmatprep.mubr.msk.bf16.mxu1 %vm1763_vm0, %v1762_v0  ;;  %v1456_v5 = vld [vmem:[#allocation8 + $0x38] sm:$0xff]   ;;  %v178_v6 = vpack.c.bf16 %v177_v4, %v176_v3  ;;  %v1457_v7 = vld [vmem:[#allocation8 + $0x30] sm:$0xff]   ;;  %v1459_v10 = vld [vmem:[#allocation8 + $0x20] sm:$0xff]   ;;  %s1118_s15 = sshll.u32 %s1764_s14, 4  ;;  %s1119_s15 = int_to_ptr.vmem [resolvable:$true] %s1118_s15 }
  0x7c   :  { %1282 = vmatpush3.bf16.msra.mxu0 %v1454_v1  ;;  %1290 = vmatpush3.bf16.msra.mxu1 %v1456_v5  ;;  %v1461_v9 = vld [vmem:[#allocation7 + $0x8] sm:$0xff]   ;;  %v1462_v12 = vld [vmem:[#allocation8 + $0x10] sm:$0xff]   ;;  %v1464_v14 = vld [vmem:[#allocation8 + $0x8] sm:$0xff]   ;;  %s1714_s16 = scalar_lea.vmem %s1119_s15, 128  ;;  %p1719_p9 = scmp.lt.s32.totalorder %s1119_s15, %s1119_s15 }
  0x7d   :  { %1283 = vmatprep.subr.bf16.mxu0 %v1762_v0  ;;  %1291 = vmatprep.subr.bf16.mxu1 %v1762_v0  ;;  %v1460_v11 = vld [vmem:[#allocation8 + $0x18] sm:$0xff]   ;;  %v1463_v13 = vld [vmem:[#allocation7] sm:$0xff]   ;;  %v1465_v15 = vld [vmem:[#allocation8] sm:$0xff]   ;;  %p1715_p8 = scmp.ne.s32.totalorder %s1119_s15, %s1714_s16  ;;  %p1720_p10 = scmp.lt.s32.totalorder %s1714_s16, %s1714_s16 }
  0x7e   :  { %v1466_v16 = vld [vmem:[#allocation10 + $0x38] sm:$0xff]   ;;  %v1467_v17 = vld [vmem:[#allocation10 + $0x30] sm:$0xff]   ;;  %v1468_v18 = vld [vmem:[#allocation10 + $0x28] sm:$0xff]  }
  0x7f   :  { %v1469_v19 = vld [vmem:[#allocation10 + $0x20] sm:$0xff]   ;;  %v1470_v20 = vld [vmem:[#allocation10 + $0x18] sm:$0xff]   ;;  %v1135_v21 = vld [vmem:[%s2004_s10] ss:$0 sm:$0xff]  ;;  %p1721_p11 = por %p1720_p10, %p1719_p9 }
  0x80   :  { %1284 = vmatpush3.bf16.msra.mxu0 %v1455_v2  ;;  %1292 = vmatpush3.bf16.msra.mxu1 %v1457_v7  ;;  %v1471_v37 = vld [vmem:[#allocation10 + $0x10] sm:$0xff]   ;;  %v1472_v38 = vld [vmem:[#allocation10 + $0x8] sm:$0xff]   ;;  %v1473_v39 = vld [vmem:[#allocation10] sm:$0xff]  }
  0x81   :  { %1309 = vmatprep.subr.bf16.mxu0 %v1762_v0  ;;  %1293 = vmatprep.subr.bf16.mxu1 %v1762_v0  ;;  %v1482_v40 = vld [vmem:[#allocation13 + $0x38] sm:$0xff]   ;;  %v1483_v41 = vld [vmem:[#allocation13 + $0x30] sm:$0xff]   ;;  %v1484_v42 = vld [vmem:[#allocation13 + $0x28] sm:$0xff]   ;;  %p1722_p12 = pnand %p1721_p11, %p1715_p8 }
  0x82   :  { %v1485_v43 = vld [vmem:[#allocation13 + $0x20] sm:$0xff]   ;;  %v1486_v44 = vld [vmem:[#allocation13 + $0x18] sm:$0xff]   ;;  %v1150_v46 = vld [vmem:[%s2004_s10 + $0x1] ss:$0 sm:$0xff] }
  0x83   :  { %1286 = vmatmul.mubr.msk.bf16.vlgmr.msra.gmra.mxu0 %vm200_vm1, %v178_v6  ;;  %v1474_v58 = vld [vmem:[#allocation11 + $0x38] sm:$0xff]   ;;  %v1475_v60 = vld [vmem:[#allocation11 + $0x30] sm:$0xff]   ;;  %v1476_v61 = vld [vmem:[#allocation11 + $0x28] sm:$0xff]  }
  0x84   :  { %1310 = vmatpush3.bf16.msra.mxu0 %v1461_v9  ;;  %1313 = vmatprep.mubr.msk.bf16.mxu0 %vm1763_vm0, %v1762_v0  ;;  %v1477_v62 = vld [vmem:[#allocation11 + $0x20] sm:$0xff]   ;;  %v1478_v63 = vld [vmem:[#allocation11 + $0x18] sm:$0xff]   ;;  %v1479_v1 = vld [vmem:[#allocation11 + $0x10] sm:$0xff]  }
  0x85   :  { %1311 = vmatprep.subr.bf16.mxu0 %v1762_v0  ;;  %1294 = vmatpush3.bf16.msra.mxu1 %v1458_v8  ;;  %v1480_v2 = vld [vmem:[#allocation11 + $0x8] sm:$0xff]   ;;  %v1481_v3 = vld [vmem:[#allocation11] sm:$0xff]   ;;  %v1487_v4 = vld [vmem:[#allocation13 + $0x10] sm:$0xff]  }
  0x86   :  { %1295 = vmatprep.subr.bf16.mxu1 %v1762_v0  ;;  %v1488_v5 = vld [vmem:[#allocation13 + $0x8] sm:$0xff]   ;;  %v1151_v7 = vld [vmem:[%s2004_s10 + $0x2] ss:$0 sm:$0xff] }
  0x88   :  { %1312 = vmatpush3.bf16.msra.mxu0 %v1463_v13 }
  0x89   :  { %1296 = vmatpush3.bf16.msra.mxu1 %v1459_v10  ;;  %1317 = vmatprep.subr.bf16.mxu0 %v1762_v0 }
  0x8a   :  { %1297 = vmatprep.subr.bf16.mxu1 %v1762_v0 }
  0x8b   :  { %1314 = vmatmul.mubr.msk.bf16.vlgmr.msra.gmra.mxu0 %vm200_vm1, %v178_v6  ;;  %v1489_v6 = vld [vmem:[#allocation13] sm:$0xff]  }
  0x8c   :  { %1333 = vmatprep.mubr.msk.bf16.mxu0 %vm1763_vm0, %v1762_v0  ;;  %1318 = vmatpush3.bf16.msra.mxu0 %v1466_v16 }
  0x8d   :  { %1298 = vmatpush3.bf16.msra.mxu1 %v1460_v11  ;;  %1319 = vmatprep.subr.bf16.mxu0 %v1762_v0 }
  0x8e   :  { %1299 = vmatprep.subr.bf16.mxu1 %v1762_v0 }
  0x90   :  { %1320 = vmatpush3.bf16.msra.mxu0 %v1467_v17 }
  0x91   :  { %1300 = vmatpush3.bf16.msra.mxu1 %v1462_v12  ;;  %1321 = vmatprep.subr.bf16.mxu0 %v1762_v0 }
  0x92   :  { %1301 = vmatprep.subr.bf16.mxu1 %v1762_v0 }
  0x94   :  { %1322 = vmatpush3.bf16.msra.mxu0 %v1468_v18  ;;  %v1490_v18 = vld [vmem:[#allocation14 + $0x38] sm:$0xff]  }
  0x95   :  { %1302 = vmatpush3.bf16.msra.mxu1 %v1464_v14  ;;  %1323 = vmatprep.subr.bf16.mxu0 %v1762_v0 }
  0x96   :  { %1303 = vmatprep.subr.bf16.mxu1 %v1762_v0 }
  0x98   :  { %1324 = vmatpush3.bf16.msra.mxu0 %v1469_v19 }
  0x99   :  { %1304 = vmatpush3.bf16.msra.mxu1 %v1465_v15  ;;  %1325 = vmatprep.subr.bf16.mxu0 %v1762_v0 }
  0x9a   :  { %1337 = vmatprep.subr.bf16.mxu1 %v1762_v0 }
  0x9c   :  { %1326 = vmatpush3.bf16.msra.mxu0 %v1470_v20  ;;  %v1491_v20 = vld [vmem:[#allocation14 + $0x30] sm:$0xff]  }
  0x9d   :  { %1327 = vmatprep.subr.bf16.mxu0 %v1762_v0 }
  0xa0   :  { %1328 = vmatpush3.bf16.msra.mxu0 %v1471_v37  ;;  %v1176_v37 = vld [vmem:[%s2004_s10 + $0x3] ss:$0 sm:$0xff] }
  0xa1   :  { %1329 = vmatprep.subr.bf16.mxu0 %v1762_v0 }
  0xa4   :  { %1330 = vmatpush3.bf16.msra.mxu0 %v1472_v38 }
  0xa5   :  { %1331 = vmatprep.subr.bf16.mxu0 %v1762_v0 }
  0xa8   :  { %1332 = vmatpush3.bf16.msra.mxu0 %v1473_v39 }
  0xa9   :  { %1357 = vmatprep.subr.bf16.mxu0 %v1762_v0 }
 0x143   :  { %v238_v22 = vpop.f32.mrf.mxu0 }
 0x144   :  { %v239_v23 = vadd.f32 %v1135_v21, %v238_v22  ;;  %v1493_v22 = vld [vmem:[#allocation14 + $0x20] sm:$0xff]  }
 0x145   :  { %v1287_v24 = vpop.f32.mrf.mxu0 }
 0x146   :  { %v247_v26 = vmul.f32 0.01, %v239_v23  ;;  %vm245_vm2 = vcmp.gt.f32.partialorder %v239_v23, 0.0 }
 0x147   :  { %v241_v25 = vpop.f32.mrf.mxu0 }
 0x148   :  { %v242_v27 = vadd.f32 %v1135_v21, %v241_v25  ;;  %v249_v30 = vsel %vm245_vm2, %v239_v23, %v247_v26  ;;  %v1492_v21 = vld [vmem:[#allocation14 + $0x28] sm:$0xff]   ;;  %v1494_v23 = vld [vmem:[#allocation14 + $0x18] sm:$0xff]  }
 0x149   :  { %v1288_v28 = vpop.f32.mrf.mxu0 }
 0x14a   :  { %vm246_vm3 = vcmp.gt.f32.partialorder %v242_v27, 0.0  ;;  %v248_v29 = vmul.f32 0.01, %v242_v27  ;;  %v1495_v28 = vld [vmem:[#allocation14 + $0x10] sm:$0xff]  }
 0x14b   :  { %v407_v33 = vpop.f32.mrf.mxu0 }
 0x14c   :  { %v250_v31 = vsel %vm246_vm3, %v242_v27, %v248_v29  ;;  %v1496_v29 = vld [vmem:[#allocation14 + $0x8] sm:$0xff]  }
 0x14d   :  { %v1914_v32 = vpack.c.bf16 %v250_v31, %v249_v30  ;;  %v1315_v34 = vpop.f32.mrf.mxu0  ;;  %v1497_v30 = vld [vmem:[#allocation14] sm:$0xff]   ;;  %v1506_v31 = vld [vmem:[#allocation17 + $0x38] sm:$0xff]  }
 0x14e   :  { %v1509_v34 = vld [vmem:[#allocation17 + $0x20] sm:$0xff]  }
 0x14f   :  { %1306 = vmatmul.mubr.bf16.vlgmr.msra.gmra.mxu1 %v1914_v32  ;;  %v410_v35 = vpop.f32.mrf.mxu0 }
 0x150   :  { %1353 = vmatprep.mubr.msk.bf16.mxu1 %vm1763_vm0, %v1762_v0  ;;  %1338 = vmatpush3.bf16.msra.mxu1 %v1482_v40 }
 0x151   :  { %v1316_v36 = vpop.f32.mrf.mxu0  ;;  %1339 = vmatprep.subr.bf16.mxu1 %v1762_v0 }
 0x154   :  { %1340 = vmatpush3.bf16.msra.mxu1 %v1483_v41 }
 0x155   :  { %1341 = vmatprep.subr.bf16.mxu1 %v1762_v0 }
 0x158   :  { %1342 = vmatpush3.bf16.msra.mxu1 %v1484_v42 }
 0x159   :  { %1343 = vmatprep.subr.bf16.mxu1 %v1762_v0 }
 0x15c   :  { %1344 = vmatpush3.bf16.msra.mxu1 %v1485_v43 }
 0x15d   :  { %1345 = vmatprep.subr.bf16.mxu1 %v1762_v0 }
 0x160   :  { %1346 = vmatpush3.bf16.msra.mxu1 %v1486_v44 }
 0x161   :  { %1347 = vmatprep.subr.bf16.mxu1 %v1762_v0 }
 0x164   :  { %1348 = vmatpush3.bf16.msra.mxu1 %v1487_v4 }
 0x165   :  { %1349 = vmatprep.subr.bf16.mxu1 %v1762_v0 }
 0x168   :  { %1350 = vmatpush3.bf16.msra.mxu1 %v1488_v5 }
 0x169   :  { %1351 = vmatprep.subr.bf16.mxu1 %v1762_v0 }
 0x16c   :  { %1352 = vmatpush3.bf16.msra.mxu1 %v1489_v6 }
 0x16d   :  { %1377 = vmatprep.subr.bf16.mxu1 %v1762_v0 }
 0x20f   :  { %v354_v45 = vpop.f32.mrf.mxu1 }
 0x210   :  { %v408_v47 = vadd.f32 %v407_v33, %v354_v45  ;;  %v1508_v33 = vld [vmem:[#allocation17 + $0x28] sm:$0xff]  }
 0x211   :  { %v1307_v48 = vpop.f32.mrf.mxu1 }
 0x212   :  { %v419_v49 = vadd.f32 %v1150_v46, %v408_v47 }
 0x213   :  { %v357_v50 = vpop.f32.mrf.mxu1 }
 0x214   :  { %v411_v51 = vadd.f32 %v410_v35, %v357_v50  ;;  %v423_v53 = vmul.f32 0.01, %v419_v49  ;;  %vm421_vm4 = vcmp.gt.f32.partialorder %v419_v49, 0.0  ;;  %v1510_v35 = vld [vmem:[#allocation17 + $0x18] sm:$0xff]  }
 0x215   :  { %v1308_v52 = vpop.f32.mrf.mxu1 }
 0x216   :  { %v420_v54 = vadd.f32 %v1150_v46, %v411_v51  ;;  %v425_v56 = vsel %vm421_vm4, %v419_v49, %v423_v53  ;;  %v1498_v49 = vld [vmem:[#allocation16 + $0x38] sm:$0xff]   ;;  %v1499_v51 = vld [vmem:[#allocation16 + $0x30] sm:$0xff]   ;;  %v1500_v52 = vld [vmem:[#allocation16 + $0x28] sm:$0xff]  }
 0x217   :  { %v1501_v53 = vld [vmem:[#allocation16 + $0x20] sm:$0xff]  }
 0x218   :  { %vm422_vm5 = vcmp.gt.f32.partialorder %v420_v54, 0.0  ;;  %v424_v55 = vmul.f32 0.01, %v420_v54 }
 0x21a   :  { %v426_v57 = vsel %vm422_vm5, %v420_v54, %v424_v55  ;;  %v1502_v54 = vld [vmem:[#allocation16 + $0x18] sm:$0xff]   ;;  %v1503_v55 = vld [vmem:[#allocation16 + $0x10] sm:$0xff]  }
 0x21b   :  { %v427_v59 = vpack.c.bf16 %v426_v57, %v425_v56  ;;  %v1504_v56 = vld [vmem:[#allocation16 + $0x8] sm:$0xff]   ;;  %v1505_v57 = vld [vmem:[#allocation16] sm:$0xff]  }
 0x21d   :  { %1334 = vmatmul.mubr.bf16.vlgmr.msra.gmra.mxu0 %v427_v59  ;;  %v1512_v59 = vld [vmem:[#allocation17 + $0x8] sm:$0xff]  }
 0x21e   :  { %1358 = vmatpush3.bf16.msra.mxu0 %v1474_v58  ;;  %1373 = vmatprep.mubr.msk.bf16.mxu0 %vm1763_vm0, %v1762_v0  ;;  %v1511_v58 = vld [vmem:[#allocation17 + $0x10] sm:$0xff]  }
 0x21f   :  { %1359 = vmatprep.subr.bf16.mxu0 %v1762_v0 }
 0x222   :  { %1360 = vmatpush3.bf16.msra.mxu0 %v1475_v60  ;;  %v1513_v60 = vld [vmem:[#allocation17] sm:$0xff]  }
 0x223   :  { %1361 = vmatprep.subr.bf16.mxu0 %v1762_v0 }
 0x226   :  { %1362 = vmatpush3.bf16.msra.mxu0 %v1476_v61  ;;  %v1177_v61 = vld [vmem:[%s2004_s10 + $0x4] ss:$0 sm:$0xff] }
 0x227   :  { %1363 = vmatprep.subr.bf16.mxu0 %v1762_v0 }
 0x22a   :  { %1364 = vmatpush3.bf16.msra.mxu0 %v1477_v62 }
 0x22b   :  { %1365 = vmatprep.subr.bf16.mxu0 %v1762_v0 }
 0x22e   :  { %1366 = vmatpush3.bf16.msra.mxu0 %v1478_v63 }
 0x22f   :  { %1367 = vmatprep.subr.bf16.mxu0 %v1762_v0 }
 0x232   :  { %1368 = vmatpush3.bf16.msra.mxu0 %v1479_v1 }
 0x233   :  { %1369 = vmatprep.subr.bf16.mxu0 %v1762_v0 }
 0x236   :  { %1370 = vmatpush3.bf16.msra.mxu0 %v1480_v2 }
 0x237   :  { %1371 = vmatprep.subr.bf16.mxu0 %v1762_v0 }
 0x23a   :  { %1372 = vmatpush3.bf16.msra.mxu0 %v1481_v3 }
 0x23b   :  { %1397 = vmatprep.subr.bf16.mxu0 %v1762_v0 }
 0x23d   :  { %1374 = vmatmul.mubr.bf16.vlgmr.msra.gmra.mxu0 %v1914_v32  ;;  %v1507_v32 = vld [vmem:[#allocation17 + $0x30] sm:$0xff]  }
 0x23e   :  { %1413 = vmatprep.mubr.msk.bf16.mxu0 %vm1763_vm0, %v1762_v0  ;;  %1398 = vmatpush3.bf16.msra.mxu0 %v1506_v31 }
 0x23f   :  { %1399 = vmatprep.subr.bf16.mxu0 %v1762_v0 }
 0x242   :  { %1400 = vmatpush3.bf16.msra.mxu0 %v1507_v32 }
 0x243   :  { %1401 = vmatprep.subr.bf16.mxu0 %v1762_v0 }
 0x246   :  { %1402 = vmatpush3.bf16.msra.mxu0 %v1508_v33 }
 0x247   :  { %1403 = vmatprep.subr.bf16.mxu0 %v1762_v0 }
 0x24a   :  { %1404 = vmatpush3.bf16.msra.mxu0 %v1509_v34 }
 0x24b   :  { %1405 = vmatprep.subr.bf16.mxu0 %v1762_v0 }
 0x24e   :  { %1406 = vmatpush3.bf16.msra.mxu0 %v1510_v35 }
 0x24f   :  { %1407 = vmatprep.subr.bf16.mxu0 %v1762_v0 }
 0x252   :  { %1408 = vmatpush3.bf16.msra.mxu0 %v1511_v58 }
 0x253   :  { %1409 = vmatprep.subr.bf16.mxu0 %v1762_v0 }
 0x256   :  { %1410 = vmatpush3.bf16.msra.mxu0 %v1512_v59 }
 0x257   :  { %1411 = vmatprep.subr.bf16.mxu0 %v1762_v0 }
 0x25a   :  { %1412 = vmatpush3.bf16.msra.mxu0 %v1513_v60 }
 0x2dd   :  { %v531_v8 = vpop.f32.mrf.mxu0 }
 0x2de   :  { %v532_v9 = vadd.f32 %v1151_v7, %v531_v8 }
 0x2df   :  { %v1335_v10 = vpop.f32.mrf.mxu0 }
 0x2e0   :  { %v540_v12 = vmul.f32 0.01, %v532_v9  ;;  %vm538_vm6 = vcmp.gt.f32.partialorder %v532_v9, 0.0 }
 0x2e1   :  { %v534_v11 = vpop.f32.mrf.mxu0 }
 0x2e2   :  { %v535_v13 = vadd.f32 %v1151_v7, %v534_v11  ;;  %v542_v16 = vsel %vm538_vm6, %v532_v9, %v540_v12 }
 0x2e3   :  { %v1336_v14 = vpop.f32.mrf.mxu0 }
 0x2e4   :  { %vm539_vm7 = vcmp.gt.f32.partialorder %v535_v13, 0.0  ;;  %v541_v15 = vmul.f32 0.01, %v535_v13 }
 0x2e6   :  { %v543_v17 = vsel %vm539_vm7, %v535_v13, %v541_v15 }
 0x2e7   :  { %v1949_v19 = vpack.c.bf16 %v543_v17, %v542_v16  ;;  %v1202_v16 = vld [vmem:[%s2004_s10 + $0x5] ss:$0 sm:$0xff] }
 0x2e9   :  { %1354 = vmatmul.mubr.bf16.vlgmr.msra.gmra.mxu1 %v1949_v19 }
 0x2ea   :  { %1378 = vmatpush3.bf16.msra.mxu1 %v1490_v18  ;;  %1393 = vmatprep.mubr.msk.bf16.mxu1 %vm1763_vm0, %v1762_v0 }
 0x2eb   :  { %1379 = vmatprep.subr.bf16.mxu1 %v1762_v0 }
 0x2ee   :  { %1380 = vmatpush3.bf16.msra.mxu1 %v1491_v20 }
 0x2ef   :  { %1381 = vmatprep.subr.bf16.mxu1 %v1762_v0 }
 0x2f2   :  { %1382 = vmatpush3.bf16.msra.mxu1 %v1492_v21 }
 0x2f3   :  { %1383 = vmatprep.subr.bf16.mxu1 %v1762_v0 }
 0x2f6   :  { %1384 = vmatpush3.bf16.msra.mxu1 %v1493_v22 }
 0x2f7   :  { %1385 = vmatprep.subr.bf16.mxu1 %v1762_v0 }
 0x2fa   :  { %1386 = vmatpush3.bf16.msra.mxu1 %v1494_v23 }
 0x2fb   :  { %1387 = vmatprep.subr.bf16.mxu1 %v1762_v0 }
 0x2fd   :  { %v748_v24 = vpop.f32.mrf.mxu0 }
 0x2fe   :  { %1388 = vmatpush3.bf16.msra.mxu1 %v1495_v28 }
 0x2ff   :  { %v1375_v25 = vpop.f32.mrf.mxu0  ;;  %1389 = vmatprep.subr.bf16.mxu1 %v1762_v0 }
 0x301   :  { %v751_v26 = vpop.f32.mrf.mxu0 }
 0x302   :  { %1390 = vmatpush3.bf16.msra.mxu1 %v1496_v29 }
 0x303   :  { %v1376_v27 = vpop.f32.mrf.mxu0  ;;  %1391 = vmatprep.subr.bf16.mxu1 %v1762_v0 }
 0x306   :  { %1392 = vmatpush3.bf16.msra.mxu1 %v1497_v30 }
 0x307   :  { %1417 = vmatprep.subr.bf16.mxu1 %v1762_v0 }
 0x3a9   :  { %v659_v36 = vpop.f32.mrf.mxu1 }
 0x3aa   :  { %v749_v38 = vadd.f32 %v748_v24, %v659_v36 }
 0x3ab   :  { %v1355_v39 = vpop.f32.mrf.mxu1 }
 0x3ac   :  { %v760_v40 = vadd.f32 %v1176_v37, %v749_v38 }
 0x3ad   :  { %v662_v41 = vpop.f32.mrf.mxu1 }
 0x3ae   :  { %v752_v42 = vadd.f32 %v751_v26, %v662_v41  ;;  %v764_v44 = vmul.f32 0.01, %v760_v40  ;;  %vm762_vm8 = vcmp.gt.f32.partialorder %v760_v40, 0.0 }
 0x3af   :  { %v1356_v43 = vpop.f32.mrf.mxu1 }
 0x3b0   :  { %v761_v45 = vadd.f32 %v1176_v37, %v752_v42  ;;  %v766_v47 = vsel %vm762_vm8, %v760_v40, %v764_v44 }
 0x3b2   :  { %vm763_vm9 = vcmp.gt.f32.partialorder %v761_v45, 0.0  ;;  %v765_v46 = vmul.f32 0.01, %v761_v45 }
 0x3b4   :  { %v767_v48 = vsel %vm763_vm9, %v761_v45, %v765_v46 }
 0x3b5   :  { %v768_v50 = vpack.c.bf16 %v767_v48, %v766_v47 }
 0x3b7   :  { %1394 = vmatmul.mubr.bf16.vlgmr.msra.gmra.mxu1 %v768_v50 }
 0x3b8   :  { %1418 = vmatpush3.bf16.msra.mxu1 %v1498_v49  ;;  %1433 = vmatprep.mubr.msk.bf16.mxu1 %vm1763_vm0, %v1762_v0 }
 0x3b9   :  { %1419 = vmatprep.subr.bf16.mxu1 %v1762_v0 }
 0x3bc   :  { %1420 = vmatpush3.bf16.msra.mxu1 %v1499_v51 }
 0x3bd   :  { %1421 = vmatprep.subr.bf16.mxu1 %v1762_v0 }
 0x3c0   :  { %1422 = vmatpush3.bf16.msra.mxu1 %v1500_v52 }
 0x3c1   :  { %1423 = vmatprep.subr.bf16.mxu1 %v1762_v0 }
 0x3c4   :  { %1424 = vmatpush3.bf16.msra.mxu1 %v1501_v53 }
 0x3c5   :  { %1425 = vmatprep.subr.bf16.mxu1 %v1762_v0 }
 0x3c8   :  { %1426 = vmatpush3.bf16.msra.mxu1 %v1502_v54 }
 0x3c9   :  { %1427 = vmatprep.subr.bf16.mxu1 %v1762_v0 }
 0x3cc   :  { %1428 = vmatpush3.bf16.msra.mxu1 %v1503_v55 }
 0x3cd   :  { %1429 = vmatprep.subr.bf16.mxu1 %v1762_v0 }
 0x3d0   :  { %1430 = vmatpush3.bf16.msra.mxu1 %v1504_v56 }
 0x3d1   :  { %1431 = vmatprep.subr.bf16.mxu1 %v1762_v0 }
 0x3d4   :  { %1432 = vmatpush3.bf16.msra.mxu1 %v1505_v57 }
 0x3d7   :  { %1434 = vmatmul.mubr.bf16.vlgmr.msra.gmra.mxu1 %v1949_v19 }
 0x477   :  { %v872_v62 = vpop.f32.mrf.mxu1 }
 0x478   :  { %v873_v63 = vadd.f32 %v1177_v61, %v872_v62 }
 0x479   :  { %v1395_v1 = vpop.f32.mrf.mxu1 }
 0x47a   :  { %v881_v3 = vmul.f32 0.01, %v873_v63  ;;  %vm879_vm10 = vcmp.gt.f32.partialorder %v873_v63, 0.0 }
 0x47b   :  { %v875_v2 = vpop.f32.mrf.mxu1 }
 0x47c   :  { %v876_v4 = vadd.f32 %v1177_v61, %v875_v2  ;;  %v883_v7 = vsel %vm879_vm10, %v873_v63, %v881_v3 }
 0x47d   :  { %v1396_v5 = vpop.f32.mrf.mxu1 }
 0x47e   :  { %vm880_vm11 = vcmp.gt.f32.partialorder %v876_v4, 0.0  ;;  %v882_v6 = vmul.f32 0.01, %v876_v4 }
 0x480   :  { %v884_v8 = vsel %vm880_vm11, %v876_v4, %v882_v6 }
 0x481   :  { %v885_v9 = vpack.c.bf16 %v884_v8, %v883_v7 }
 0x483   :  { %1414 = vmatmul.mubr.bf16.vlgmr.msra.gmra.mxu0 %v885_v9 }
 0x497   :  { %v1089_v0 = vpop.f32.mrf.mxu1 }
 0x499   :  { %v1435_v10 = vpop.f32.mrf.mxu1 }
 0x49b   :  { %v1092_v11 = vpop.f32.mrf.mxu1 }
 0x49d   :  { %v1436_v12 = vpop.f32.mrf.mxu1 }
 0x543   :  { %v1000_v13 = vpop.f32.mrf.mxu0 }
 0x544   :  { %v1090_v15 = vadd.f32 %v1089_v0, %v1000_v13 }
 0x545   :  { %v1415_v14 = vpop.f32.mrf.mxu0 }
 0x546   :  { %v1101_v20 = vadd.f32 %v1202_v16, %v1090_v15 }
 0x547   :  { %v1003_v17 = vpop.f32.mrf.mxu0 }
 0x548   :  { %v1093_v18 = vadd.f32 %v1092_v11, %v1003_v17 }
 0x549   :  { %v1416_v19 = vpop.f32.mrf.mxu0 }
 0x54a   :  { %v1102_v21 = vadd.f32 %v1202_v16, %v1093_v18 }
 0x54c   :  { %v1210_v22 = vpack.c.bf16 %v1102_v21, %v1101_v20 }
 0x54e   :  { %1211 = vst [vmem:[#allocation19] sm:$0xff] %v1210_v22  }
 0x54f   :  { %1725 = shalt.err (!%p1722_p12)
}
 0x550   :  { %1124 = dma.vmem_to_hbm [thread:$0]  %s1119_s15, 128, %s2005_s11, [#allocation4], %s1749_s20, %s1749_s20, %s1750_s21  }
 0x551   :  { %1746 = dma.done.wait [#allocation4], 128  }
 0x552   :  { %1747 = vsyncadd [#allocation4], 4294967168 }
 0x553   :  { %1128 = vsyncpa [#allocation3], 1 }
 0x554   :  { %1129 = vsyncpa [#allocation6], 1 }
 0x555   :  { %1130 = vsyncpa [#allocation9], 1 }
 0x556   :  { %1131 = vsyncpa [#allocation12], 1 }
 0x557   :  { %1132 = vsyncpa [#allocation15], 1 }
 0x558   :  { %1133 = vsyncpa [#allocation18], 1 }
 0x559   :  { %1134 = vsyncpa [#allocation4], 1 }

</bundles_post_ra>
